<compile_context>
chip_gen: v6e
topology: v6e:2x2x1
jax: 0.10.0
libtpu: 0.0.40
codegen_flags: <defaults>
</compile_context>

<pallas_src>
import jax
import jax.numpy as jnp
from jax import lax
from jax.experimental import pallas as pl
from jax.experimental.pallas import tpu as pltpu


def _nw_kernel(w_ref, q_ref, k_ref, v_ref, yhat_ref, attn_ref):
    """One (tq, n_k) query tile of Nadaraya-Watson regression.

    w_ref    : (1,)       scalar parameter in SMEM
    q_ref    : (tq, 1)    queries tile
    k_ref    : (tq, n_k)  keys tile (native dtype)
    v_ref    : (1, n_k)   values row (resident)
    yhat_ref : (1, tq)    lane-major y_hat tile
    attn_ref : (tq, n_k)  softmax weights tile
    """
    w = w_ref[0]
    q = q_ref[...].astype(jnp.float32)                    # (tq, 1)
    k = k_ref[...].astype(jnp.float32)                    # (tq, n_k)

    diff = k - q                                          # broadcast over lanes
    logits = (-0.5 * w) * (diff * diff)                   # (tq, n_k)

    # Numerically-stable softmax over the key (lane) axis, exact normalisation.
    m = jnp.max(logits, axis=1, keepdims=True)            # (tq, 1)   XLU
    e = jnp.exp(logits - m)                               # (tq, n_k) EUP
    denom = jnp.sum(e, axis=1, keepdims=True)             # (tq, 1)   XLU
    attn = e / denom                                      # exact -> rows sum to 1
    attn_ref[...] = attn.astype(attn_ref.dtype)

    # y_hat from the *same* normalised attention, lane-major via the idle MXU:
    #   red[0, t] = sum_k values[k] * attn[t, k]
    red = lax.dot_general(v_ref[...].astype(jnp.float32), attn,
                          (((1,), (1,)), ((), ())),
                          preferred_element_type=jnp.float32)   # (1, tq)
    yhat_ref[...] = red.astype(yhat_ref.dtype)


def _vmem_limit_bytes():
    """Per-generation scoped-VMEM limit: ~3/4 of physical, capped at 96 MiB.
    (v7x: 64 MiB physical -> 48 MiB; v5e/v6e: 128 MiB -> 96 MiB.)"""
    try:
        cap = pltpu.get_tpu_info().vmem_capacity_bytes
    except Exception:
        cap = 64 * 1024 * 1024            # conservative: v7x per-TC VMEM
    return min((cap * 3) // 4, 96 * 1024 * 1024)


def _choose_tq(n_q, n_k, key_dtype, vmem_limit_bytes):
    """Query-tile size.

    Single tile when the whole problem fits the budget; otherwise the largest
    multiple of 128 (lane-dense (1, tq) y_hat stores) that fits VMEM and still
    leaves >= 4 grid steps so each of v7x's 2 TensorCores pipelines >= 2 iters.
    """
    key_bytes = jnp.dtype(key_dtype).itemsize
    # keys tile + attn tile, each double-buffered by the pipeline, + ~3 f32 temps.
    bytes_per_row = n_k * (2 * key_bytes + 2 * key_bytes + 3 * 4) + 64
    budget = (vmem_limit_bytes * 3) // 5
    cap_rows = max(8, budget // bytes_per_row)

    if n_q <= cap_rows:
        return n_q                          # single tile, blocks == full dims

    tq = max(128, min(1024, (cap_rows // 128) * 128))
    while tq > 128 and pl.cdiv(n_q, tq) < 4:
        tq -= 128
    if tq >= n_q:
        return n_q
    return tq


def nw_kernel_regression(queries, keys, values, weight, *, tq=None):
    """Pallas implementation of NWKernelRegression.forward.

    queries: (n_q,), keys: (n_q, n_k), values: (n_k,), weight: (1,)
    returns (y_hats: (n_q,), weights: (n_q, n_k))
    """
    n_q, n_k = keys.shape
    vmem_limit = _vmem_limit_bytes()
    if tq is None:
        tq = _choose_tq(n_q, n_k, keys.dtype, vmem_limit)
    grid = pl.cdiv(n_q, tq)                 # partial tail blocks handled by Pallas

    attn_dtype = keys.dtype
    yhat_dtype = jnp.promote_types(keys.dtype, values.dtype)

    q2 = queries.reshape(n_q, 1)            # native dtype, streamed per-tile
    v2 = values.reshape(1, n_k)             # native dtype, resident in VMEM
    w = weight.reshape(1).astype(jnp.float32)

    yhat_row, attn = pl.pallas_call(
        _nw_kernel,
        out_shape=(
            jax.ShapeDtypeStruct((1, n_q), yhat_dtype),    # y_hats, lane-major
            jax.ShapeDtypeStruct((n_q, n_k), attn_dtype),  # attention weights
        ),
        grid=(grid,),
        in_specs=[
            pl.BlockSpec(memory_space=pltpu.MemorySpace.SMEM),  # weight scalar
            pl.BlockSpec((tq, 1), lambda i: (i, 0)),            # queries tile
            pl.BlockSpec((tq, n_k), lambda i: (i, 0)),          # keys tile
            pl.BlockSpec((1, n_k), lambda i: (0, 0)),           # values (resident)
        ],
        out_specs=(
            pl.BlockSpec((1, tq), lambda i: (0, i)),            # y_hats tile
            pl.BlockSpec((tq, n_k), lambda i: (i, 0)),          # weights tile
        ),
        compiler_params=pltpu.CompilerParams(
            dimension_semantics=("parallel",),
            vmem_limit_bytes=vmem_limit,
        ),
    )(w, q2, keys, v2)

    return yhat_row.reshape(n_q), attn


def nw_reference(queries, keys, values, weight):
    """Pure-JAX reference matching the PyTorch forward exactly."""
    logits = -weight[0] * (keys - queries[:, None]) ** 2 / 2
    attn = jax.nn.softmax(logits, axis=1)
    yhat = values @ attn.T
    return yhat, attn


if __name__ == "__main__":
    n_q, n_k = 16, 64

    key = jax.random.PRNGKey(0)
    k_q, k_k, k_v, k_w = jax.random.split(key, 4)

    queries = jax.random.uniform(k_q, (n_q,), dtype=jnp.float32) * 5.0
    keys = jax.random.uniform(k_k, (n_q, n_k), dtype=jnp.float32) * 5.0
    values = jax.random.uniform(k_v, (n_k,), dtype=jnp.float32)
    # deterministic init of the (1,) parameter (torch.rand analogue)
    weight = jax.random.uniform(k_w, (1,), dtype=jnp.float32)

    y_hats, attn = nw_kernel_regression(queries, keys, values, weight)
    jax.block_until_ready((y_hats, attn))

    y_ref, attn_ref = nw_reference(queries, keys, values, weight)
    assert y_hats.shape == (n_q,) and attn.shape == (n_q, n_k)
    assert jnp.allclose(attn, attn_ref, rtol=1e-5, atol=1e-5)
    assert jnp.allclose(y_hats, y_ref, rtol=1e-5, atol=1e-5)
    assert jnp.allclose(jnp.sum(attn, axis=1), 1.0, atol=1e-5)

    print("KERNEL_OK")
</pallas_src>

<mosaic_0001>
module attributes {stable_mosaic.version = 11 : i64} {
  func.func @_nw_kernel(%arg0: i32, %arg1: memref<1xf32, #tpu.memory_space<smem>>, %arg2: memref<16x1xf32, #tpu.memory_space<vmem>>, %arg3: memref<16x64xf32, #tpu.memory_space<vmem>>, %arg4: memref<1x64xf32, #tpu.memory_space<vmem>>, %arg5: memref<1x16xf32, #tpu.memory_space<vmem>>, %arg6: memref<16x64xf32, #tpu.memory_space<vmem>>) attributes {dimension_semantics = [#tpu.dimension_semantics<parallel>], iteration_bounds = array<i64: 1>, scalar_prefetch = 0 : i64, scratch_operands = 0 : i64, tpu.core_type = #tpu.core_type<tc>, window_params = [{transform_indices = @transform_0, window_bounds = array<i64: 1>}, {transform_indices = @transform_1, window_bounds = array<i64: 16, 1>}, {transform_indices = @transform_2, window_bounds = array<i64: 16, 64>}, {pipeline_mode = #tpu.pipeline_mode<synchronous>, transform_indices = @transform_3, window_bounds = array<i64: 1, 64>}, {transform_indices = @transform_4, window_bounds = array<i64: 1, 16>}, {transform_indices = @transform_5, window_bounds = array<i64: 16, 64>}]} {
    %c0 = arith.constant 0 : index
    %0 = memref.load %arg1[%c0] : memref<1xf32, #tpu.memory_space<smem>>
    %c0_0 = arith.constant 0 : index
    %c0_1 = arith.constant 0 : index
    %1 = vector.load %arg2[%c0_0, %c0_1] : memref<16x1xf32, #tpu.memory_space<vmem>>, vector<16x1xf32>
    %c0_2 = arith.constant 0 : index
    %c0_3 = arith.constant 0 : index
    %2 = vector.load %arg3[%c0_2, %c0_3] : memref<16x64xf32, #tpu.memory_space<vmem>>, vector<16x64xf32>
    %3 = vector.broadcast %1 : vector<16x1xf32> to vector<16x64xf32>
    %4 = arith.subf %2, %3 : vector<16x64xf32>
    %cst = arith.constant -5.000000e-01 : f32
    %5 = arith.mulf %cst, %0 : f32
    %6 = arith.mulf %4, %4 : vector<16x64xf32>
    %7 = vector.broadcast %5 : f32 to vector<16x64xf32>
    %8 = arith.mulf %7, %6 : vector<16x64xf32>
    %cst_4 = arith.constant dense<0xFF800000> : vector<16xf32>
    %9 = vector.multi_reduction <maximumf>, %8, %cst_4 [1] : vector<16x64xf32> to vector<16xf32>
    %10 = vector.shape_cast %9 : vector<16xf32> to vector<16x1xf32>
    %11 = vector.broadcast %10 : vector<16x1xf32> to vector<16x64xf32>
    %12 = arith.subf %8, %11 : vector<16x64xf32>
    %13 = math.exp %12 : vector<16x64xf32>
    %cst_5 = arith.constant dense<0.000000e+00> : vector<16xf32>
    %14 = vector.multi_reduction <add>, %13, %cst_5 [1] : vector<16x64xf32> to vector<16xf32>
    %15 = vector.shape_cast %14 : vector<16xf32> to vector<16x1xf32>
    %16 = vector.broadcast %15 : vector<16x1xf32> to vector<16x64xf32>
    %17 = arith.divf %13, %16 : vector<16x64xf32>
    %c0_6 = arith.constant 0 : index
    %c0_7 = arith.constant 0 : index
    %18 = vector.load %arg6[%c0_6, %c0_7] : memref<16x64xf32, #tpu.memory_space<vmem>>, vector<16x64xf32>
    tpu.vector_store %arg6[%c0_6, %c0_7], %17 {strides = array<i32>} : memref<16x64xf32, #tpu.memory_space<vmem>>, vector<16x64xf32>,
    %c0_8 = arith.constant 0 : index
    %c0_9 = arith.constant 0 : index
    %19 = vector.load %arg4[%c0_8, %c0_9] : memref<1x64xf32, #tpu.memory_space<vmem>>, vector<1x64xf32>
    %cst_10 = arith.constant dense<0.000000e+00> : vector<1x16xf32>
    %20 = tpu.matmul %19, %17, %cst_10 {dimension_numbers = #tpu.dot_dimension_numbers<[1], [1], [0], [0], [0, 0, 1, 0], [], []>} : vector<1x64xf32>, vector<16x64xf32>, vector<1x16xf32> -> vector<1x16xf32>
    %c0_11 = arith.constant 0 : index
    %c0_12 = arith.constant 0 : index
    %21 = vector.load %arg5[%c0_11, %c0_12] : memref<1x16xf32, #tpu.memory_space<vmem>>, vector<1x16xf32>
    tpu.vector_store %arg5[%c0_11, %c0_12], %20 {strides = array<i32>} : memref<1x16xf32, #tpu.memory_space<vmem>>, vector<1x16xf32>,
    return
  }
  func.func @transform_0(%arg0: i32) -> i32 {
    %c0_i32 = arith.constant 0 : i32
    %c0_i32_0 = arith.constant 0 : i32
    return %c0_i32 : i32
  }
  func.func @transform_1(%arg0: i32) -> (i32, i32) {
    %c0_i32 = arith.constant 0 : i32
    %c0_i32_0 = arith.constant 0 : i32
    return %arg0, %c0_i32 : i32, i32
  }
  func.func @transform_2(%arg0: i32) -> (i32, i32) {
    %c0_i32 = arith.constant 0 : i32
    %c0_i32_0 = arith.constant 0 : i32
    return %arg0, %c0_i32 : i32, i32
  }
  func.func @transform_3(%arg0: i32) -> (i32, i32) {
    %c0_i32 = arith.constant 0 : i32
    %c0_i32_0 = arith.constant 0 : i32
    %c0_i32_1 = arith.constant 0 : i32
    return %c0_i32, %c0_i32_0 : i32, i32
  }
  func.func @transform_4(%arg0: i32) -> (i32, i32) {
    %c0_i32 = arith.constant 0 : i32
    %c0_i32_0 = arith.constant 0 : i32
    return %c0_i32, %arg0 : i32, i32
  }
  func.func @transform_5(%arg0: i32) -> (i32, i32) {
    %c0_i32 = arith.constant 0 : i32
    %c0_i32_0 = arith.constant 0 : i32
    return %arg0, %c0_i32 : i32, i32
  }
}

</mosaic_0001>

<bundles_post_ra>
// kernel: tpu_custom_call.1
= control target key start
LH: loop header
LB: loop body
LE: loop exit
PB: predicated region body
PF: predicated region fallthrough
CT: control target
= control target key end

     0   :  { %12 = vsyncpa [#allocation4], 0  ;;  %v255_v1 = vmov 0   ;;  %s325_s0 = inlined_call_operand.<no memory space> [shape: f32[1], index: 0, kind: input, shape index: {}]   ;;  %s326_s1 = inlined_call_operand.vmem [shape: f32[16,1], index: 1, kind: input, shape index: {}]   ;;  %s327_s2 = inlined_call_operand.vmem [shape: f32[16,64], index: 2, kind: input, shape index: {}]   ;;  %s328_s3 = inlined_call_operand.vmem [shape: f32[1,64], index: 3, kind: input, shape index: {}]   ;;  %s329_s4 = inlined_call_operand.hbm [shape: f32[1,16], index: 4, kind: output, shape index: {0}]   ;;  %s330_s5 = inlined_call_operand.hbm [shape: f32[16,64], index: 5, kind: output, shape index: {1}]  }
   0x1   :  { %v24_v0 = vld [vmem:[%s326_s1 + $0x8] sm:$0xff]  ;;  %202 = vset.pattern.permute.xlu0 %v255_v1 }
   0x2   :  { %13 = vsyncpa [#allocation6], 0  ;;  %34 = vperm.xlu0 %202, %v24_v0   ;;  %v23_v2 = vld [vmem:[%s326_s1] sm:$0xff]  ;;  %v26_v3 = vld [vmem:[%s327_s2 + $0x8] sm:$0xff]  ;;  %s39_s26 = smul.f32 -0.5, %s325_s0  ;;  %vm45_vm0 = vcmask 523264  }
   0x3   :  { %v25_v6 = vld [vmem:[%s327_s2] sm:$0xff]  ;;  %v256_v26 = vmov 0.0   ;;  %vm257_vm1 = vmmov 0   ;;  %s258_s2 = smov [#allocation5]  }
   0x4   :  { %v42_v7 = vstv %s39_s26  ;;  %188 = vmatprep.subr.mxu0 %v256_v26  ;;  %192 = vmatprep.mubr.msk.f32.mxu0 %vm257_vm1, %v256_v26  ;;  %v70_v33 = vld [vmem:[%s328_s3] sm:$0x1]  ;;  %s167_s29 = sshll.u32 %s258_s2, 4  ;;  %s168_s29 = int_to_ptr.vmem [resolvable:$true] %s167_s29 }
   0x5   :  { %s211_s30 = scalar_lea.vmem %s168_s29, 256  ;;  %p216_p1 = scmp.lt.s32.totalorder %s168_s29, %s168_s29 }
   0x6   :  { %29 = vperm.xlu0 %202, %v23_v2   ;;  %p212_p0 = scmp.ne.s32.totalorder %s168_s29, %s211_s30  ;;  %p217_p2 = scmp.lt.s32.totalorder %s211_s30, %s211_s30 }
   0x8   :  { %p218_p3 = por %p217_p2, %p216_p1 }
   0xa   :  { %p219_p4 = pnand %p218_p3, %p212_p0 }
  0x7d   :  { %v35_v4 = vpop.permute.xlu0 %34 }
  0x7e   :  { %v38_v5 = vsub.f32 %v26_v3, %v35_v4 }
  0x80   :  { %v41_v8 = vmul.f32 %v38_v5, %v38_v5 }
  0x81   :  { %v30_v9 = vpop.permute.xlu0 %29 }
  0x82   :  { %v37_v10 = vsub.f32 %v25_v6, %v30_v9  ;;  %v44_v11 = vmul.f32 %v42_v7, %v41_v8 }
  0x84   :  { %v40_v12 = vmul.f32 %v37_v10, %v37_v10  ;;  %v49_v13 = vsel %vm45_vm0, %v44_v11, -inf }
  0x85   :  { %50 = vmax.xlane.f32.xlu1 %v49_v13 }
  0x86   :  { %v43_v14 = vmul.f32 %v42_v7, %v40_v12 }
  0x88   :  { %v46_v15 = vsel %vm45_vm0, %v43_v14, -inf }
  0x89   :  { %47 = vmax.xlane.f32.xlu1 %v46_v15 }
 0x10e   :  { %v51_v16 = vpop.xlane.xlu1 %50 }
 0x10f   :  { %v53_v17 = vsub.f32 %v44_v11, %v51_v16 }
 0x111   :  { %v56_v18 = vmul.f32 1.442695, %v53_v17 }
 0x112   :  { %v48_v19 = vpop.xlane.xlu1 %47 }
 0x113   :  { %203 = vpow2.f32 %v56_v18  ;;  %v52_v20 = vsub.f32 %v43_v14, %v48_v19 }
 0x115   :  { %v54_v21 = vmul.f32 1.442695, %v52_v20 }
 0x117   :  { %205 = vpow2.f32 %v54_v21 }
 0x120   :  { %v204_v22 = vpop.eup %203 }
 0x121   :  { %v61_v23 = vsel %vm45_vm0, %v204_v22, 0.0 }
 0x122   :  { %62 = vadd.xlane.f32.xlu0 %v61_v23 }
 0x124   :  { %v206_v24 = vpop.eup %205 }
 0x125   :  { %v58_v25 = vsel %vm45_vm0, %v206_v24, 0.0 }
 0x126   :  { %59 = vadd.xlane.f32.xlu1 %v58_v25 }
 0x1ab   :  { %v63_v27 = vpop.xlane.xlu0 %62 }
 0x1ac   :  { %207 = vrcp.f32 %v63_v27 }
 0x1af   :  { %v60_v28 = vpop.xlane.xlu1 %59 }
 0x1b0   :  { %209 = vrcp.f32 %v60_v28 }
 0x1b9   :  { %v208_v29 = vpop.eup %207 }
 0x1ba   :  { %v67_v30 = vmul.f32 %v208_v29, %v204_v22 }
 0x1bc   :  { %69 = vst.msk [vmem:[#allocation5 + $0x8] sm:$0xff] %vm45_vm0, %v67_v30  ;;  %189 = vmatpush3.xpose.msk.msra.mxu0 %vm45_vm0, %v67_v30 }
 0x1bd   :  { %v210_v31 = vpop.eup %209  ;;  %190 = vmatprep.subr.mxu0 %v256_v26 }
 0x1be   :  { %v65_v32 = vmul.f32 %v210_v31, %v206_v24 }
 0x1c0   :  { %191 = vmatpush3.xpose.msk.msra.mxu0 %vm45_vm0, %v65_v32  ;;  %68 = vst.msk [vmem:[#allocation5] sm:$0xff] %vm45_vm0, %v65_v32 }
 0x1c3   :  { %193 = vmatmul.mubr.msk.f32.vlgmr.msra.gmra.mxu0 %vm45_vm0, %v70_v33 }
 0x1c4   :  { %222 = shalt.err (!%p219_p4)
}
 0x1c5   :  { %s259_s6 = smov 128   ;;  %s260_s7 = smov 8   ;;  %vm150_vm2 = vcmask 122880  }
 0x1c6   :  { %173 = dma.vmem_to_hbm [thread:$0]  %s168_s29, 256, %s330_s5, [#allocation6], %s259_s6, %s259_s6, %s260_s7  }
 0x1c7   :  { %s261_s10 = smov [#allocation3]  }
 0x1c8   :  { %s158_s3 = sshll.u32 %s261_s10, 4  ;;  %s159_s3 = int_to_ptr.vmem [resolvable:$true] %s158_s3 }
 0x1c9   :  { %s231_s11 = scalar_lea.vmem %s159_s3, 16  ;;  %s235_s12 = scalar_lea.vmem %s159_s3, 32 }
 0x1ca   :  { %p232_p5 = scmp.ne.s32.totalorder %s159_s3, %s231_s11  ;;  %p236_p6 = scmp.lt.s32.totalorder %s159_s3, %s159_s3 }
 0x1cb   :  { %p237_p7 = scmp.lt.s32.totalorder %s235_s12, %s231_s11 }
 0x1cd   :  { %p238_p8 = por %p237_p7, %p236_p6 }
 0x1cf   :  { %p239_p9 = pnand %p238_p8, %p232_p5 }
 0x283   :  { %v146_v34 = vpop.f32.mrf.mxu0 }
 0x284   :  { %151 = vst.msk [vmem:[#allocation3] sm:$0x1] %vm150_vm2, %v146_v34 }
 0x285   :  { %v194_v35 = vpop.f32.mrf.mxu0 }
 0x286   :  { %242 = shalt.err (!%p239_p9)
}
 0x287   :  { %161 = dma.vmem_to_hbm [thread:$0]  %s159_s3, 16, %s329_s4, [#allocation4]  }
 0x288   :  { %251 = dma.done.wait [#allocation4], 16  }
 0x289   :  { %252 = vsyncadd [#allocation4], 4294967280 }
 0x28a   :  { %253 = dma.done.wait [#allocation6], 256  }
 0x28b   :  { %254 = vsyncadd [#allocation6], 4294967040 }
 0x28c   :  { %180 = vsyncpa [#allocation4], 1 }
 0x28d   :  { %181 = vsyncpa [#allocation6], 1 }

</bundles_post_ra>
